<compile_context>
chip_gen: v7x
topology: tpu7x:2x2x1
jax: 0.10.0
libtpu: 0.0.40
codegen_flags: <defaults>
</compile_context>

<pallas_src>
import functools

import jax
import jax.numpy as jnp
from jax.experimental import pallas as pl
from jax.experimental.pallas import tpu as pltpu


LANE = 128     # lane width; spatial axis is reshaped to (rows, LANE)
CHUNK = 64     # sublane rows per in-kernel chunk (64x128 f32 = 8 vregs/channel)
R_MAX = 1024   # max rows per grid step (per folded image) -> ~2.5 MB input/step


def _conv1x1_kernel(x_ref, w_ref, b_ref, o_ref, *, c_in, c_out, b_n, chunk):
    # x_ref: VMEM (B_N, C_in, R_TILE, 128)   w_ref: SMEM (C_out*C_in,)
    # b_ref: SMEM (C_out,)                   o_ref: VMEM (B_N, C_out, R_TILE, 128)
    n_chunks = x_ref.shape[2] // chunk  # R_TILE is a multiple of `chunk` by construction

    def body(c, carry):
        r0 = pl.multiple_of(c * chunk, chunk)
        rs = pl.ds(r0, chunk)
        for bn in range(b_n):                      # tiny static loops -> unrolled
            for co in range(c_out):
                # scalar-broadcast multiply-add chain on dense (chunk,128) slabs
                acc = x_ref[bn, 0, rs, :] * w_ref[co * c_in + 0]
                for ci in range(1, c_in):
                    acc = acc + x_ref[bn, ci, rs, :] * w_ref[co * c_in + ci]
                # direct per-output-channel store (no concatenate), lane-dense
                o_ref[bn, co, rs, :] = (acc + b_ref[co]).astype(o_ref.dtype)
        return carry

    jax.lax.fori_loop(0, n_chunks, body, 0, unroll=False)


@functools.partial(jax.jit, static_argnames=("out_channels", "out_dtype"))
def ensembler_forward(x_nchw, weight, bias, out_channels=1, out_dtype=jnp.float32):
    """Forward pass of Ensembler.

    Args:
      x_nchw:  (N, C_in, H, W) float32
      weight:  (C_out, C_in, 1, 1) float32  (PyTorch Conv2d weight layout)
      bias:    (C_out,) float32
      out_dtype: output dtype (keep float32 to match the PyTorch module;
                 bf16 halves output HBM traffic if downstream tolerates it).
    Returns:
      dict(out=(N, C_out, H, W) out_dtype)
    """
    N, C_in, H, W = x_nchw.shape
    C_out = weight.shape[0]
    assert C_out == out_channels

    HW = H * W
    HW_pad = pl.cdiv(HW, LANE) * LANE
    x3 = x_nchw.reshape(N, C_in, HW)
    if HW_pad != HW:
        # TODO(synk): a ragged-tail kernel would avoid this padded copy; it is
        # only taken when H*W is not a multiple of 128.
        x3 = jnp.pad(x3, ((0, 0), (0, 0), (0, HW_pad - HW)))
    rows = HW_pad // LANE
    # Sublane-dense layout: rows on the sublane axis, lanes full at 128.
    x4 = x3.reshape(N, C_in, rows, LANE)

    # --- Row-tile selection (ceil-div grid; partial edge blocks are fine) ---
    if rows <= CHUNK:
        r_tile, chunk = rows, rows              # single-chunk small block
    else:
        r_tile = min(R_MAX, (rows // CHUNK) * CHUNK)   # multiple of CHUNK
        chunk = CHUNK
        if N == 1:
            # v7x has 2 TensorCores: keep >=2 parallel grid tiles per chip.
            half = -(-((rows + 1) // 2) // chunk) * chunk
            r_tile = min(r_tile, max(chunk, half))

    # --- Fold batch images into one block when images are small -------------
    # Keeps per-step DMA in the MB range (b_n * rows <= R_MAX).
    b_n = 1
    if rows < R_MAX and N > 1:
        want = max(1, min(8, R_MAX // max(rows, 1)))
        for d in range(min(want, N), 0, -1):
            if N % d == 0:
                b_n = d
                break

    grid = (N // b_n, pl.cdiv(rows, r_tile))

    # Weights / bias live as SMEM scalars — no padded VMEM weight tile.
    w_flat = weight.reshape(C_out * C_in).astype(jnp.float32)
    b_flat = bias.reshape(C_out).astype(jnp.float32)

    out4 = pl.pallas_call(
        functools.partial(_conv1x1_kernel, c_in=C_in, c_out=C_out,
                          b_n=b_n, chunk=chunk),
        out_shape=jax.ShapeDtypeStruct((N, C_out, rows, LANE), out_dtype),
        grid_spec=pltpu.PrefetchScalarGridSpec(
            num_scalar_prefetch=0,
            grid=grid,
            in_specs=[
                pl.BlockSpec((b_n, C_in, r_tile, LANE),
                             lambda nb, rt: (nb, 0, rt, 0)),
                pl.BlockSpec(memory_space=pltpu.MemorySpace.SMEM),
                pl.BlockSpec(memory_space=pltpu.MemorySpace.SMEM),
            ],
            out_specs=pl.BlockSpec((b_n, C_out, r_tile, LANE),
                                   lambda nb, rt: (nb, 0, rt, 0)),
        ),
        compiler_params=pltpu.CompilerParams(
            dimension_semantics=("parallel", "parallel")),
    )(x4, w_flat, b_flat)

    out3 = out4.reshape(N, C_out, HW_pad)
    if HW_pad != HW:
        out3 = out3[:, :, :HW]
    return dict(out=out3.reshape(N, C_out, H, W))


def init_params(key, in_channels, out_channels=1):
    """Deterministic synthetic init matching nn.Conv2d(in_channels, out_channels, 1)."""
    kw, kb = jax.random.split(key)
    bound = 1.0 / jnp.sqrt(jnp.float32(in_channels))
    weight = jax.random.uniform(kw, (out_channels, in_channels, 1, 1),
                                jnp.float32, -bound, bound)
    bias = jax.random.uniform(kb, (out_channels,), jnp.float32, -bound, bound)
    return weight, bias


def _reference(x, weight, bias):
    c_out, c_in = weight.shape[0], weight.shape[1]
    return (jnp.einsum("nchw,oc->nohw", x, weight.reshape(c_out, c_in))
            + bias.reshape(1, c_out, 1, 1))


if __name__ == "__main__":
    key = jax.random.PRNGKey(0)
    k_x, k_p, k_x2 = jax.random.split(key, 3)

    # Main test shape (matches the module's intended use).
    N, C_in, H, W = 2, 4, 16, 16
    C_out = 1
    x = jax.random.normal(k_x, (N, C_in, H, W), jnp.float32)
    weight, bias = init_params(k_p, C_in, C_out)

    out = ensembler_forward(x, weight, bias, out_channels=C_out)
    jax.block_until_ready(out["out"])
    ref = _reference(x, weight, bias)
    assert out["out"].shape == (N, C_out, H, W)
    assert jnp.allclose(out["out"], ref, atol=1e-5, rtol=1e-5)

    # Secondary check: H*W not a multiple of 128 (ragged-tail / pad path), N=1.
    x2 = jax.random.normal(k_x2, (1, C_in, 24, 24), jnp.float32)
    out2 = ensembler_forward(x2, weight, bias, out_channels=C_out)
    jax.block_until_ready(out2["out"])
    ref2 = _reference(x2, weight, bias)
    assert out2["out"].shape == (1, C_out, 24, 24)
    assert jnp.allclose(out2["out"], ref2, atol=1e-5, rtol=1e-5)

    print("KERNEL_OK")
</pallas_src>

<mosaic_0001>
module attributes {stable_mosaic.version = 11 : i64} {
  func.func @_conv1x1_kernel(%arg0: i32, %arg1: i32, %arg2: memref<2x4x2x128xf32, #tpu.memory_space<vmem>>, %arg3: memref<4xf32, #tpu.memory_space<smem>>, %arg4: memref<1xf32, #tpu.memory_space<smem>>, %arg5: memref<2x1x2x128xf32, #tpu.memory_space<vmem>>) attributes {dimension_semantics = [#tpu.dimension_semantics<parallel>, #tpu.dimension_semantics<parallel>], iteration_bounds = array<i64: 1, 1>, scalar_prefetch = 0 : i64, scratch_operands = 0 : i64, tpu.core_type = #tpu.core_type<tc>, window_params = [{transform_indices = @transform_0, window_bounds = array<i64: 2, 4, 2, 128>}, {transform_indices = @transform_1, window_bounds = array<i64: 4>}, {transform_indices = @transform_2, window_bounds = array<i64: 1>}, {transform_indices = @transform_3, window_bounds = array<i64: 2, 1, 2, 128>}]} {
    %c0_i32 = arith.constant 0 : i32
    %c2_i32 = arith.constant 2 : i32
    %0 = arith.muli %c0_i32, %c2_i32 : i32
    %1 = tpu.assume_multiple %0, 2 : i32
    %c0 = arith.constant 0 : index
    %c0_0 = arith.constant 0 : index
    %2 = arith.index_cast %1 : i32 to index
    %c0_1 = arith.constant 0 : index
    %3 = vector.load %arg2[%c0, %c0_0, %2, %c0_1] : memref<2x4x2x128xf32, #tpu.memory_space<vmem>>, vector<1x1x2x128xf32>
    %4 = vector.shape_cast %3 : vector<1x1x2x128xf32> to vector<2x128xf32>
    %c0_2 = arith.constant 0 : index
    %5 = memref.load %arg3[%c0_2] : memref<4xf32, #tpu.memory_space<smem>>
    %6 = vector.broadcast %5 : f32 to vector<2x128xf32>
    %7 = arith.mulf %4, %6 : vector<2x128xf32>
    %c0_3 = arith.constant 0 : index
    %c1 = arith.constant 1 : index
    %8 = arith.index_cast %1 : i32 to index
    %c0_4 = arith.constant 0 : index
    %9 = vector.load %arg2[%c0_3, %c1, %8, %c0_4] : memref<2x4x2x128xf32, #tpu.memory_space<vmem>>, vector<1x1x2x128xf32>
    %10 = vector.shape_cast %9 : vector<1x1x2x128xf32> to vector<2x128xf32>
    %c1_5 = arith.constant 1 : index
    %11 = memref.load %arg3[%c1_5] : memref<4xf32, #tpu.memory_space<smem>>
    %12 = vector.broadcast %11 : f32 to vector<2x128xf32>
    %13 = arith.mulf %10, %12 : vector<2x128xf32>
    %14 = arith.addf %7, %13 : vector<2x128xf32>
    %c0_6 = arith.constant 0 : index
    %c2 = arith.constant 2 : index
    %15 = arith.index_cast %1 : i32 to index
    %c0_7 = arith.constant 0 : index
    %16 = vector.load %arg2[%c0_6, %c2, %15, %c0_7] : memref<2x4x2x128xf32, #tpu.memory_space<vmem>>, vector<1x1x2x128xf32>
    %17 = vector.shape_cast %16 : vector<1x1x2x128xf32> to vector<2x128xf32>
    %c2_8 = arith.constant 2 : index
    %18 = memref.load %arg3[%c2_8] : memref<4xf32, #tpu.memory_space<smem>>
    %19 = vector.broadcast %18 : f32 to vector<2x128xf32>
    %20 = arith.mulf %17, %19 : vector<2x128xf32>
    %21 = arith.addf %14, %20 : vector<2x128xf32>
    %c0_9 = arith.constant 0 : index
    %c3 = arith.constant 3 : index
    %22 = arith.index_cast %1 : i32 to index
    %c0_10 = arith.constant 0 : index
    %23 = vector.load %arg2[%c0_9, %c3, %22, %c0_10] : memref<2x4x2x128xf32, #tpu.memory_space<vmem>>, vector<1x1x2x128xf32>
    %24 = vector.shape_cast %23 : vector<1x1x2x128xf32> to vector<2x128xf32>
    %c3_11 = arith.constant 3 : index
    %25 = memref.load %arg3[%c3_11] : memref<4xf32, #tpu.memory_space<smem>>
    %26 = vector.broadcast %25 : f32 to vector<2x128xf32>
    %27 = arith.mulf %24, %26 : vector<2x128xf32>
    %28 = arith.addf %21, %27 : vector<2x128xf32>
    %c0_12 = arith.constant 0 : index
    %29 = memref.load %arg4[%c0_12] : memref<1xf32, #tpu.memory_space<smem>>
    %30 = vector.broadcast %29 : f32 to vector<2x128xf32>
    %31 = arith.addf %28, %30 : vector<2x128xf32>
    %c0_13 = arith.constant 0 : index
    %c0_14 = arith.constant 0 : index
    %32 = arith.index_cast %1 : i32 to index
    %c0_15 = arith.constant 0 : index
    %33 = vector.load %arg5[%c0_13, %c0_14, %32, %c0_15] : memref<2x1x2x128xf32, #tpu.memory_space<vmem>>, vector<1x1x2x128xf32>
    %34 = vector.shape_cast %33 : vector<1x1x2x128xf32> to vector<2x128xf32>
    %35 = vector.shape_cast %31 : vector<2x128xf32> to vector<1x1x2x128xf32>
    tpu.vector_store %arg5[%c0_13, %c0_14, %32, %c0_15], %35 {strides = array<i32>} : memref<2x1x2x128xf32, #tpu.memory_space<vmem>>, vector<1x1x2x128xf32>,
    %c1_16 = arith.constant 1 : index
    %c0_17 = arith.constant 0 : index
    %36 = arith.index_cast %1 : i32 to index
    %c0_18 = arith.constant 0 : index
    %37 = vector.load %arg2[%c1_16, %c0_17, %36, %c0_18] : memref<2x4x2x128xf32, #tpu.memory_space<vmem>>, vector<1x1x2x128xf32>
    %38 = vector.shape_cast %37 : vector<1x1x2x128xf32> to vector<2x128xf32>
    %c0_19 = arith.constant 0 : index
    %39 = memref.load %arg3[%c0_19] : memref<4xf32, #tpu.memory_space<smem>>
    %40 = vector.broadcast %39 : f32 to vector<2x128xf32>
    %41 = arith.mulf %38, %40 : vector<2x128xf32>
    %c1_20 = arith.constant 1 : index
    %c1_21 = arith.constant 1 : index
    %42 = arith.index_cast %1 : i32 to index
    %c0_22 = arith.constant 0 : index
    %43 = vector.load %arg2[%c1_20, %c1_21, %42, %c0_22] : memref<2x4x2x128xf32, #tpu.memory_space<vmem>>, vector<1x1x2x128xf32>
    %44 = vector.shape_cast %43 : vector<1x1x2x128xf32> to vector<2x128xf32>
    %c1_23 = arith.constant 1 : index
    %45 = memref.load %arg3[%c1_23] : memref<4xf32, #tpu.memory_space<smem>>
    %46 = vector.broadcast %45 : f32 to vector<2x128xf32>
    %47 = arith.mulf %44, %46 : vector<2x128xf32>
    %48 = arith.addf %41, %47 : vector<2x128xf32>
    %c1_24 = arith.constant 1 : index
    %c2_25 = arith.constant 2 : index
    %49 = arith.index_cast %1 : i32 to index
    %c0_26 = arith.constant 0 : index
    %50 = vector.load %arg2[%c1_24, %c2_25, %49, %c0_26] : memref<2x4x2x128xf32, #tpu.memory_space<vmem>>, vector<1x1x2x128xf32>
    %51 = vector.shape_cast %50 : vector<1x1x2x128xf32> to vector<2x128xf32>
    %c2_27 = arith.constant 2 : index
    %52 = memref.load %arg3[%c2_27] : memref<4xf32, #tpu.memory_space<smem>>
    %53 = vector.broadcast %52 : f32 to vector<2x128xf32>
    %54 = arith.mulf %51, %53 : vector<2x128xf32>
    %55 = arith.addf %48, %54 : vector<2x128xf32>
    %c1_28 = arith.constant 1 : index
    %c3_29 = arith.constant 3 : index
    %56 = arith.index_cast %1 : i32 to index
    %c0_30 = arith.constant 0 : index
    %57 = vector.load %arg2[%c1_28, %c3_29, %56, %c0_30] : memref<2x4x2x128xf32, #tpu.memory_space<vmem>>, vector<1x1x2x128xf32>
    %58 = vector.shape_cast %57 : vector<1x1x2x128xf32> to vector<2x128xf32>
    %c3_31 = arith.constant 3 : index
    %59 = memref.load %arg3[%c3_31] : memref<4xf32, #tpu.memory_space<smem>>
    %60 = vector.broadcast %59 : f32 to vector<2x128xf32>
    %61 = arith.mulf %58, %60 : vector<2x128xf32>
    %62 = arith.addf %55, %61 : vector<2x128xf32>
    %c0_32 = arith.constant 0 : index
    %63 = memref.load %arg4[%c0_32] : memref<1xf32, #tpu.memory_space<smem>>
    %64 = vector.broadcast %63 : f32 to vector<2x128xf32>
    %65 = arith.addf %62, %64 : vector<2x128xf32>
    %c1_33 = arith.constant 1 : index
    %c0_34 = arith.constant 0 : index
    %66 = arith.index_cast %1 : i32 to index
    %c0_35 = arith.constant 0 : index
    %67 = vector.load %arg5[%c1_33, %c0_34, %66, %c0_35] : memref<2x1x2x128xf32, #tpu.memory_space<vmem>>, vector<1x1x2x128xf32>
    %68 = vector.shape_cast %67 : vector<1x1x2x128xf32> to vector<2x128xf32>
    %69 = vector.shape_cast %65 : vector<2x128xf32> to vector<1x1x2x128xf32>
    tpu.vector_store %arg5[%c1_33, %c0_34, %66, %c0_35], %69 {strides = array<i32>} : memref<2x1x2x128xf32, #tpu.memory_space<vmem>>, vector<1x1x2x128xf32>,
    %c1_i32 = arith.constant 1 : i32
    return
  }
  func.func @transform_0(%arg0: i32, %arg1: i32) -> (i32, i32, i32, i32) {
    %c0_i32 = arith.constant 0 : i32
    %c0_i32_0 = arith.constant 0 : i32
    %c0_i32_1 = arith.constant 0 : i32
    return %arg0, %c0_i32, %arg1, %c0_i32_0 : i32, i32, i32, i32
  }
  func.func @transform_1(%arg0: i32, %arg1: i32) -> i32 {
    %c0_i32 = arith.constant 0 : i32
    %c0_i32_0 = arith.constant 0 : i32
    return %c0_i32 : i32
  }
  func.func @transform_2(%arg0: i32, %arg1: i32) -> i32 {
    %c0_i32 = arith.constant 0 : i32
    %c0_i32_0 = arith.constant 0 : i32
    return %c0_i32 : i32
  }
  func.func @transform_3(%arg0: i32, %arg1: i32) -> (i32, i32, i32, i32) {
    %c0_i32 = arith.constant 0 : i32
    %c0_i32_0 = arith.constant 0 : i32
    %c0_i32_1 = arith.constant 0 : i32
    return %arg0, %c0_i32, %arg1, %c0_i32_0 : i32, i32, i32, i32
  }
}

</mosaic_0001>

<bundles_post_ra>
// kernel: ensembler_forward.1
= control target key start
LH: loop header
LB: loop body
LE: loop exit
PB: predicated region body
PF: predicated region fallthrough
CT: control target
= control target key end

     0   :  { %9 = vsyncpa [#allocation4], 0  ;;  %s188_s0 = inlined_call_operand.vmem [shape: f32[2,4,2,128], index: 0, kind: input, shape index: {}]   ;;  %s189_s1 = inlined_call_operand.vmem [shape: f32[4], index: 1, kind: input, shape index: {}]   ;;  %s190_s2 = inlined_call_operand.<no memory space> [shape: f32[1], index: 2, kind: input, shape index: {}]   ;;  %s191_s3 = inlined_call_operand.vmem [shape: f32[2,1,2,128], index: 3, kind: output, shape index: {}]  }
   0x1   :  { %s18_s14 = sshll.u32 %s189_s1, 4  ;;  %s19_s14 = int_to_ptr.vmem [resolvable:$true] %s18_s14 }
   0x2   :  { %s117_s15 = scalar_lea.vmem %s19_s14, 16  ;;  %p122_p1 = scmp.lt.s32.totalorder %s19_s14, %s19_s14 }
   0x3   :  { %p118_p0 = scmp.ne.s32.totalorder %s19_s14, %s117_s15  ;;  %p123_p2 = scmp.lt.s32.totalorder %s117_s15, %s117_s15 }
   0x5   :  { %p124_p3 = por %p123_p2, %p122_p1 }
   0x7   :  { %p125_p4 = pnand %p124_p3, %p118_p0 }
   0x9   :  { %128 = shalt.err (!%p125_p4)
}
   0xa   :  { %s131_s16 = smov [#allocation3]  }
   0xb   :  { %21 = dma.vmem_to_smem %s19_s14, 16, %s131_s16, [#allocation4]  }
   0xc   :  { %129 = dma.done.wait [#allocation4], 16  }
   0xd   :  { %130 = vsyncadd [#allocation4], 4294967280 }
   0xe   :  { %27 = sfence }
   0xf   :  { %s29_s17 = sld [smem:[#allocation3]]  ;;  %s103_s18 = sld [smem:[#allocation3 + $0x1]]  ;;  %v28_v0 = vld [vmem:[%s188_s0] sm:$0x3]  ;;  %v108_v1 = vld [vmem:[%s188_s0 + $0x8] sm:$0x3]  ;;  %v54_v24 = vstv %s190_s2 }
  0x10   :  { %s105_s19 = sld [smem:[#allocation3 + $0x2]]  ;;  %s107_s20 = sld [smem:[#allocation3 + $0x3]]  ;;  %v102_v2 = vld [vmem:[%s188_s0 + $0x2] sm:$0x3]  ;;  %v104_v3 = vld [vmem:[%s188_s0 + $0x4] sm:$0x3] }
  0x11   :  { %v109_v4 = vld [vmem:[%s188_s0 + $0xa] sm:$0x3]  ;;  %v111_v6 = vld [vmem:[%s188_s0 + $0xc] sm:$0x3]  ;;  %v106_v10 = vld [vmem:[%s188_s0 + $0x6] sm:$0x3] }
  0x12   :  { %v113_v12 = vld [vmem:[%s188_s0 + $0xe] sm:$0x3] }
  0x15   :  { %v30_v5 = vstv %s29_s17  ;;  %v36_v8 = vstv %s103_s18 }
  0x16   :  { %v31_v7 = vmul.f32 %v30_v5, %v28_v0  ;;  %v43_v9 = vstv %s105_s19  ;;  %v62_v11 = vmul.f32 %v108_v1, %v30_v5  ;;  %v37_v13 = vmul.f32 %v102_v2, %v36_v8 }
  0x17   :  { %v44_v14 = vmul.f32 %v104_v3, %v43_v9  ;;  %v50_v15 = vstv %s107_s20  ;;  %v68_v16 = vmul.f32 %v109_v4, %v36_v8  ;;  %v75_v17 = vmul.f32 %v111_v6, %v43_v9 }
  0x18   :  { %v38_v18 = vadd.f32 %v37_v13, %v31_v7  ;;  %v51_v19 = vmul.f32 %v106_v10, %v50_v15  ;;  %v82_v21 = vmul.f32 %v113_v12, %v50_v15 }
  0x19   :  { %v69_v20 = vadd.f32 %v68_v16, %v62_v11 }
  0x1a   :  { %v45_v22 = vadd.f32 %v44_v14, %v38_v18 }
  0x1b   :  { %v76_v23 = vadd.f32 %v75_v17, %v69_v20 }
  0x1c   :  { %v52_v25 = vadd.f32 %v51_v19, %v45_v22 }
  0x1d   :  { %v83_v26 = vadd.f32 %v82_v21, %v76_v23 }
  0x1e   :  { %v55_v27 = vadd.f32 %v54_v24, %v52_v25 }
  0x1f   :  { %v86_v28 = vadd.f32 %v83_v26, %v54_v24 }
  0x20   :  { %56 = vst [vmem:[%s191_s3] sm:$0x3] %v55_v27 }
  0x21   :  { %115 = vst [vmem:[%s191_s3 + $0x2] sm:$0x3] %v86_v28 }
  0x22   :  { %93 = vsyncpa [#allocation4], 1 }

</bundles_post_ra>
